<compile_context>
chip_gen: v5e
topology: v5e:2x2
jax: 0.10.0
libtpu: 0.0.40
codegen_flags: <defaults>
</compile_context>

<pallas_src>
import functools

import jax
import jax.numpy as jnp
from jax.experimental import pallas as pl
from jax.experimental.pallas import tpu as pltpu

LN_EPS = 1e-5


# --------------------------------------------------------------------------- #
# Kernel
# --------------------------------------------------------------------------- #
def dynamic_pos_bias_kernel(
    x_ref,       # [3, TN]       biases, transposed (coord dim on sublanes)
    pvec_ref,    # [P, 12]       cols: w_proj^T (3) | b_proj | g1 be1 b1 | g2 be2 b2 | g3 be3
    wslab_ref,   # [4, R, P]     [W1^T pad, W2^T pad, W3^T pad, b3 in col 0]
    out_ref,     # [Hp, TN]
    *, residual: bool, pos_dim: int, out_rows: int,
):
    P = pos_dim
    Hp = out_rows

    x = x_ref[...].astype(jnp.float32)        # [3, TN]
    pv = pvec_ref[...].astype(jnp.float32)    # [P, 12]

    # pos_proj: Linear(3 -> P) as three broadcast multiply-adds on the VPU.
    pos = (pv[:, 0:1] * x[0:1, :]
           + pv[:, 1:2] * x[1:2, :]
           + pv[:, 2:3] * x[2:3, :]
           + pv[:, 3:4])                       # [P, TN]

    def ln_relu(h, gamma, beta):
        # LayerNorm over the feature (sublane) axis, biased variance,
        # numerically robust two-pass (x - mean)^2 form, eps = 1e-5.
        mean = jnp.mean(h, axis=0, keepdims=True)            # [1, TN]
        d = h - mean
        var = jnp.mean(d * d, axis=0, keepdims=True)          # [1, TN]
        hhat = d * jax.lax.rsqrt(var + LN_EPS)
        return jnp.maximum(hhat * gamma + beta, 0.0)

    def linear_t(wt, h, b):
        # y[out, n] = sum_in W[in, out] * h[in, n] + b[out]   (wt = W^T)
        n_in = h.shape[0]
        if n_in <= 16:
            # Tiny contraction: unrolled broadcast FMAs on the VPU (an 8x8
            # stationary matrix would waste the MXU and force relayouts).
            y = wt[:, 0:1] * h[0:1, :]
            for k in range(1, n_in):
                y = y + wt[:, k:k + 1] * h[k:k + 1, :]
            return y + b
        return jnp.dot(wt, h, preferred_element_type=jnp.float32) + b

    w1t = wslab_ref[0][:P, :]                  # [P, P]
    w2t = wslab_ref[1][:P, :]                  # [P, P]
    w3t = wslab_ref[2][:Hp, :]                 # [Hp, P]  (rows >= H are zero)
    b3 = wslab_ref[3][:Hp, 0:1]                # [Hp, 1]  (rows >= H are zero)

    h1 = linear_t(w1t, ln_relu(pos, pv[:, 4:5], pv[:, 5:6]), pv[:, 6:7])
    pos = pos + h1 if residual else h1

    h2 = linear_t(w2t, ln_relu(pos, pv[:, 7:8], pv[:, 8:9]), pv[:, 9:10])
    pos = pos + h2 if residual else h2

    out = linear_t(w3t, ln_relu(pos, pv[:, 10:11], pv[:, 11:12]), b3)   # [Hp, TN]
    out_ref[...] = out.astype(out_ref.dtype)


# --------------------------------------------------------------------------- #
# Parameter packing
# --------------------------------------------------------------------------- #
def pack_params(params):
    """Pack the 14 small parameter tensors into 2 arrays laid out for the
    transposed (feature-on-sublane, rows-on-lane) kernel."""
    P = params["w_proj"].shape[1]
    H = params["w3"].shape[1]
    Hp = ((H + 7) // 8) * 8          # pad output sublane dim to 8 -> unmasked vst
    R = max(P, Hp)

    cols = [
        params["w_proj"].T,                                  # [P, 3]
        params["b_proj"].reshape(P, 1),
        params["g1"].reshape(P, 1), params["be1"].reshape(P, 1), params["b1"].reshape(P, 1),
        params["g2"].reshape(P, 1), params["be2"].reshape(P, 1), params["b2"].reshape(P, 1),
        params["g3"].reshape(P, 1), params["be3"].reshape(P, 1),
    ]
    pvec = jnp.concatenate(cols, axis=1).astype(jnp.float32)            # [P, 12]

    wslab = jnp.zeros((4, R, P), jnp.float32)
    wslab = wslab.at[0, :P, :].set(params["w1"].T.astype(jnp.float32))  # W1^T
    wslab = wslab.at[1, :P, :].set(params["w2"].T.astype(jnp.float32))  # W2^T
    wslab = wslab.at[2, :H, :].set(params["w3"].T.astype(jnp.float32))  # W3^T
    wslab = wslab.at[3, :H, 0].set(params["b3"].astype(jnp.float32))    # b3
    return pvec, wslab, Hp


# --------------------------------------------------------------------------- #
# Wrappers
# --------------------------------------------------------------------------- #
def _dpb_padded(biases, params, *, residual, max_tile):
    """Runs the kernel; returns ([Hp, n_pad] output, H, N)."""
    assert max_tile % 128 == 0 and max_tile >= 128
    N = biases.shape[0]
    P = params["w_proj"].shape[1]
    H = params["w3"].shape[1]

    pvec, wslab, Hp = pack_params(params)

    # Few, large grid steps: 1 step for tiny N, otherwise >= 2 steps (keeps
    # both v7x TensorCores busy; negligible extra cost on 1-TC v5e/v6e), and
    # more only when a single step would exceed `max_tile` columns.
    round128 = pl.cdiv(N, 128) * 128
    if round128 <= 128:
        num_steps = 1
    else:
        num_steps = max(2, pl.cdiv(round128, max_tile))
    tile = pl.cdiv(round128, num_steps * 128) * 128
    n_pad = num_steps * tile

    # Single small pad+transpose on the input (lane-dense [3, n_pad]).
    x_t = jnp.pad(biases.astype(jnp.float32).T, ((0, 0), (0, n_pad - N)))

    kernel = functools.partial(
        dynamic_pos_bias_kernel, residual=residual, pos_dim=P, out_rows=Hp)

    out_t = pl.pallas_call(
        kernel,
        out_shape=jax.ShapeDtypeStruct((Hp, n_pad), jnp.float32),
        grid_spec=pltpu.PrefetchScalarGridSpec(
            num_scalar_prefetch=0,
            grid=(num_steps,),
            in_specs=[
                pl.BlockSpec((3, tile), lambda i: (0, i)),        # biases tile
                pl.BlockSpec(pvec.shape, lambda i: (0, 0)),       # packed vectors
                pl.BlockSpec(wslab.shape, lambda i: (0, 0, 0)),   # packed weights
            ],
            out_specs=pl.BlockSpec((Hp, tile), lambda i: (0, i)),
        ),
        compiler_params=pltpu.CompilerParams(
            dimension_semantics=("parallel",),     # rows independent -> megacore
            vmem_limit_bytes=32 * 1024 * 1024,     # far above actual use, portable
        ),
    )(x_t, pvec, wslab)
    return out_t, H, N


def dynamic_pos_bias_hn(biases, params, *, residual=True, max_tile=8192):
    """Kernel-native layout: returns [num_heads, N] float32 (no transpose).
    Prefer this entry point when the consumer gathers the bias table per head."""
    out_t, H, N = _dpb_padded(biases, params, residual=residual, max_tile=max_tile)
    return out_t[:H, :N]


def dynamic_pos_bias(biases, params, *, residual=True, max_tile=8192):
    """PyTorch-module-compatible: biases [N, 3] -> [N, num_heads] float32."""
    out_t, H, N = _dpb_padded(biases, params, residual=residual, max_tile=max_tile)
    return out_t[:H, :N].T


# --------------------------------------------------------------------------- #
# Init + pure-JAX reference
# --------------------------------------------------------------------------- #
def init_params(key, dim, num_heads):
    """Weights stored as [in, out] (x @ W + b); bias/LN params as 1-D vectors."""
    P = dim // 4
    keys = jax.random.split(key, 4)

    def lin(k, fan_in, fan_out):
        w = jax.random.normal(k, (fan_in, fan_out), jnp.float32) / jnp.sqrt(float(fan_in))
        b = jnp.zeros((fan_out,), jnp.float32)
        return w, b

    w_proj, b_proj = lin(keys[0], 3, P)
    w1, b1 = lin(keys[1], P, P)
    w2, b2 = lin(keys[2], P, P)
    w3, b3 = lin(keys[3], P, num_heads)

    ones_p = jnp.ones((P,), jnp.float32)
    zeros_p = jnp.zeros((P,), jnp.float32)
    return {
        "w_proj": w_proj, "b_proj": b_proj,
        "g1": ones_p, "be1": zeros_p, "w1": w1, "b1": b1,
        "g2": ones_p, "be2": zeros_p, "w2": w2, "b2": b2,
        "g3": ones_p, "be3": zeros_p, "w3": w3, "b3": b3,
    }


def reference(biases, params, residual=True):
    """Pure-JAX reference mirroring the PyTorch forward."""
    def ln(x, g, b):
        mean = jnp.mean(x, axis=-1, keepdims=True)
        var = jnp.mean((x - mean) ** 2, axis=-1, keepdims=True)
        return (x - mean) * jax.lax.rsqrt(var + LN_EPS) * g + b

    def block(h, g, be, w, b):
        return jnp.maximum(ln(h, g, be), 0.0) @ w + b

    pos = biases @ params["w_proj"] + params["b_proj"]
    if residual:
        pos = pos + block(pos, params["g1"], params["be1"], params["w1"], params["b1"])
        pos = pos + block(pos, params["g2"], params["be2"], params["w2"], params["b2"])
        pos = block(pos, params["g3"], params["be3"], params["w3"], params["b3"])
    else:
        pos = block(pos, params["g1"], params["be1"], params["w1"], params["b1"])
        pos = block(pos, params["g2"], params["be2"], params["w2"], params["b2"])
        pos = block(pos, params["g3"], params["be3"], params["w3"], params["b3"])
    return pos


# --------------------------------------------------------------------------- #
# Demo / self-check
# --------------------------------------------------------------------------- #
if __name__ == "__main__":
    key = jax.random.PRNGKey(0)
    k_param, k_bias = jax.random.split(key)

    dim = 32                     # -> pos_dim = 8
    num_heads = 4
    # N for a 4x4x4 group: (2*4-1)^3 = 343 relative-position triples
    # (deliberately NOT a multiple of 128 -> exercises the padded tail and the
    #  2-step grid path).
    N = 343

    params = init_params(k_param, dim, num_heads)
    biases = jax.random.normal(k_bias, (N, 3), jnp.float32)

    # Residual variant (2 grid steps).
    ref = reference(biases, params, residual=True)
    out = jax.block_until_ready(dynamic_pos_bias(biases, params, residual=True))
    assert out.shape == (N, num_heads)
    assert jnp.allclose(out, ref, atol=2e-4, rtol=2e-4), "mismatch (residual)"

    # Kernel-native [H, N] layout matches the same numbers.
    out_hn = jax.block_until_ready(dynamic_pos_bias_hn(biases, params, residual=True))
    assert out_hn.shape == (num_heads, N)
    assert jnp.allclose(out_hn, ref.T, atol=2e-4, rtol=2e-4), "mismatch ([H,N] layout)"

    # Non-residual variant.
    ref_nr = reference(biases, params, residual=False)
    out_nr = jax.block_until_ready(dynamic_pos_bias(biases, params, residual=False))
    assert jnp.allclose(out_nr, ref_nr, atol=2e-4, rtol=2e-4), "mismatch (no residual)"

    # Tiny-N path (single grid step).
    Ns = 77
    biases_s = jax.random.normal(jax.random.PRNGKey(1), (Ns, 3), jnp.float32)
    ref_s = reference(biases_s, params, residual=True)
    out_s = jax.block_until_ready(dynamic_pos_bias(biases_s, params, residual=True))
    assert jnp.allclose(out_s, ref_s, atol=2e-4, rtol=2e-4), "mismatch (small N)"

    print("KERNEL_OK")
</pallas_src>

<mosaic_0001>
module attributes {stable_mosaic.version = 11 : i64} {
  func.func @dynamic_pos_bias_kernel(%arg0: i32, %arg1: memref<3x256xf32, #tpu.memory_space<vmem>>, %arg2: memref<8x12xf32, #tpu.memory_space<vmem>>, %arg3: memref<4x8x8xf32, #tpu.memory_space<vmem>>, %arg4: memref<8x256xf32, #tpu.memory_space<vmem>>) attributes {dimension_semantics = [#tpu.dimension_semantics<parallel>], iteration_bounds = array<i64: 2>, scalar_prefetch = 0 : i64, scratch_operands = 0 : i64, tpu.core_type = #tpu.core_type<tc>, window_params = [{transform_indices = @transform_0, window_bounds = array<i64: 3, 256>}, {pipeline_mode = #tpu.pipeline_mode<synchronous>, transform_indices = @transform_1, window_bounds = array<i64: 8, 12>}, {pipeline_mode = #tpu.pipeline_mode<synchronous>, transform_indices = @transform_2, window_bounds = array<i64: 4, 8, 8>}, {transform_indices = @transform_3, window_bounds = array<i64: 8, 256>}]} {
    %c0 = arith.constant 0 : index
    %c0_0 = arith.constant 0 : index
    %0 = vector.load %arg1[%c0, %c0_0] : memref<3x256xf32, #tpu.memory_space<vmem>>, vector<3x256xf32>
    %c0_1 = arith.constant 0 : index
    %c0_2 = arith.constant 0 : index
    %1 = vector.load %arg2[%c0_1, %c0_2] : memref<8x12xf32, #tpu.memory_space<vmem>>, vector<8x12xf32>
    %2 = vector.extract_strided_slice %1 {offsets = [0, 0], sizes = [8, 1], strides = [1, 1]} : vector<8x12xf32> to vector<8x1xf32>
    %3 = vector.extract_strided_slice %0 {offsets = [0, 0], sizes = [1, 256], strides = [1, 1]} : vector<3x256xf32> to vector<1x256xf32>
    %4 = vector.broadcast %2 : vector<8x1xf32> to vector<8x256xf32>
    %5 = vector.broadcast %3 : vector<1x256xf32> to vector<8x256xf32>
    %6 = arith.mulf %4, %5 : vector<8x256xf32>
    %7 = vector.extract_strided_slice %1 {offsets = [0, 1], sizes = [8, 1], strides = [1, 1]} : vector<8x12xf32> to vector<8x1xf32>
    %8 = vector.extract_strided_slice %0 {offsets = [1, 0], sizes = [1, 256], strides = [1, 1]} : vector<3x256xf32> to vector<1x256xf32>
    %9 = vector.broadcast %7 : vector<8x1xf32> to vector<8x256xf32>
    %10 = vector.broadcast %8 : vector<1x256xf32> to vector<8x256xf32>
    %11 = arith.mulf %9, %10 : vector<8x256xf32>
    %12 = arith.addf %6, %11 : vector<8x256xf32>
    %13 = vector.extract_strided_slice %1 {offsets = [0, 2], sizes = [8, 1], strides = [1, 1]} : vector<8x12xf32> to vector<8x1xf32>
    %14 = vector.extract_strided_slice %0 {offsets = [2, 0], sizes = [1, 256], strides = [1, 1]} : vector<3x256xf32> to vector<1x256xf32>
    %15 = vector.broadcast %13 : vector<8x1xf32> to vector<8x256xf32>
    %16 = vector.broadcast %14 : vector<1x256xf32> to vector<8x256xf32>
    %17 = arith.mulf %15, %16 : vector<8x256xf32>
    %18 = arith.addf %12, %17 : vector<8x256xf32>
    %19 = vector.extract_strided_slice %1 {offsets = [0, 3], sizes = [8, 1], strides = [1, 1]} : vector<8x12xf32> to vector<8x1xf32>
    %20 = vector.broadcast %19 : vector<8x1xf32> to vector<8x256xf32>
    %21 = arith.addf %18, %20 : vector<8x256xf32>
    %c0_3 = arith.constant 0 : index
    %c0_4 = arith.constant 0 : index
    %c0_5 = arith.constant 0 : index
    %22 = vector.load %arg3[%c0_3, %c0_4, %c0_5] : memref<4x8x8xf32, #tpu.memory_space<vmem>>, vector<1x8x8xf32>
    %23 = vector.shape_cast %22 : vector<1x8x8xf32> to vector<8x8xf32>
    %c1 = arith.constant 1 : index
    %c0_6 = arith.constant 0 : index
    %c0_7 = arith.constant 0 : index
    %24 = vector.load %arg3[%c1, %c0_6, %c0_7] : memref<4x8x8xf32, #tpu.memory_space<vmem>>, vector<1x8x8xf32>
    %25 = vector.shape_cast %24 : vector<1x8x8xf32> to vector<8x8xf32>
    %c2 = arith.constant 2 : index
    %c0_8 = arith.constant 0 : index
    %c0_9 = arith.constant 0 : index
    %26 = vector.load %arg3[%c2, %c0_8, %c0_9] : memref<4x8x8xf32, #tpu.memory_space<vmem>>, vector<1x8x8xf32>
    %27 = vector.shape_cast %26 : vector<1x8x8xf32> to vector<8x8xf32>
    %c3 = arith.constant 3 : index
    %c0_10 = arith.constant 0 : index
    %c0_11 = arith.constant 0 : index
    %28 = vector.load %arg3[%c3, %c0_10, %c0_11] : memref<4x8x8xf32, #tpu.memory_space<vmem>>, vector<1x8x8xf32>
    %29 = vector.shape_cast %28 : vector<1x8x8xf32> to vector<8x8xf32>
    %30 = vector.extract_strided_slice %29 {offsets = [0, 0], sizes = [8, 1], strides = [1, 1]} : vector<8x8xf32> to vector<8x1xf32>
    %31 = vector.extract_strided_slice %1 {offsets = [0, 4], sizes = [8, 1], strides = [1, 1]} : vector<8x12xf32> to vector<8x1xf32>
    %32 = vector.extract_strided_slice %1 {offsets = [0, 5], sizes = [8, 1], strides = [1, 1]} : vector<8x12xf32> to vector<8x1xf32>
    %cst = arith.constant dense<0.000000e+00> : vector<256xf32>
    %33 = vector.multi_reduction <add>, %21, %cst [0] : vector<8x256xf32> to vector<256xf32>
    %34 = vector.shape_cast %33 : vector<256xf32> to vector<1x256xf32>
    %cst_12 = arith.constant 8.000000e+00 : f32
    %35 = vector.broadcast %cst_12 : f32 to vector<1x256xf32>
    %36 = arith.divf %34, %35 : vector<1x256xf32>
    %37 = vector.broadcast %36 : vector<1x256xf32> to vector<8x256xf32>
    %38 = arith.subf %21, %37 : vector<8x256xf32>
    %39 = arith.mulf %38, %38 : vector<8x256xf32>
    %cst_13 = arith.constant dense<0.000000e+00> : vector<256xf32>
    %40 = vector.multi_reduction <add>, %39, %cst_13 [0] : vector<8x256xf32> to vector<256xf32>
    %41 = vector.shape_cast %40 : vector<256xf32> to vector<1x256xf32>
    %cst_14 = arith.constant 8.000000e+00 : f32
    %42 = vector.broadcast %cst_14 : f32 to vector<1x256xf32>
    %43 = arith.divf %41, %42 : vector<1x256xf32>
    %cst_15 = arith.constant 9.99999974E-6 : f32
    %44 = vector.broadcast %cst_15 : f32 to vector<1x256xf32>
    %45 = arith.addf %43, %44 : vector<1x256xf32>
    %46 = math.rsqrt %45 : vector<1x256xf32>
    %47 = vector.broadcast %46 : vector<1x256xf32> to vector<8x256xf32>
    %48 = arith.mulf %38, %47 : vector<8x256xf32>
    %49 = vector.broadcast %31 : vector<8x1xf32> to vector<8x256xf32>
    %50 = arith.mulf %48, %49 : vector<8x256xf32>
    %51 = vector.broadcast %32 : vector<8x1xf32> to vector<8x256xf32>
    %52 = arith.addf %50, %51 : vector<8x256xf32>
    %cst_16 = arith.constant 0.000000e+00 : f32
    %53 = vector.broadcast %cst_16 : f32 to vector<8x256xf32>
    %54 = arith.maximumf %52, %53 : vector<8x256xf32>
    %55 = vector.extract_strided_slice %1 {offsets = [0, 6], sizes = [8, 1], strides = [1, 1]} : vector<8x12xf32> to vector<8x1xf32>
    %56 = vector.extract_strided_slice %23 {offsets = [0, 0], sizes = [8, 1], strides = [1, 1]} : vector<8x8xf32> to vector<8x1xf32>
    %57 = vector.extract_strided_slice %54 {offsets = [0, 0], sizes = [1, 256], strides = [1, 1]} : vector<8x256xf32> to vector<1x256xf32>
    %58 = vector.broadcast %56 : vector<8x1xf32> to vector<8x256xf32>
    %59 = vector.broadcast %57 : vector<1x256xf32> to vector<8x256xf32>
    %60 = arith.mulf %58, %59 : vector<8x256xf32>
    %61 = vector.extract_strided_slice %23 {offsets = [0, 1], sizes = [8, 1], strides = [1, 1]} : vector<8x8xf32> to vector<8x1xf32>
    %62 = vector.extract_strided_slice %54 {offsets = [1, 0], sizes = [1, 256], strides = [1, 1]} : vector<8x256xf32> to vector<1x256xf32>
    %63 = vector.broadcast %61 : vector<8x1xf32> to vector<8x256xf32>
    %64 = vector.broadcast %62 : vector<1x256xf32> to vector<8x256xf32>
    %65 = arith.mulf %63, %64 : vector<8x256xf32>
    %66 = arith.addf %60, %65 : vector<8x256xf32>
    %67 = vector.extract_strided_slice %23 {offsets = [0, 2], sizes = [8, 1], strides = [1, 1]} : vector<8x8xf32> to vector<8x1xf32>
    %68 = vector.extract_strided_slice %54 {offsets = [2, 0], sizes = [1, 256], strides = [1, 1]} : vector<8x256xf32> to vector<1x256xf32>
    %69 = vector.broadcast %67 : vector<8x1xf32> to vector<8x256xf32>
    %70 = vector.broadcast %68 : vector<1x256xf32> to vector<8x256xf32>
    %71 = arith.mulf %69, %70 : vector<8x256xf32>
    %72 = arith.addf %66, %71 : vector<8x256xf32>
    %73 = vector.extract_strided_slice %23 {offsets = [0, 3], sizes = [8, 1], strides = [1, 1]} : vector<8x8xf32> to vector<8x1xf32>
    %74 = vector.extract_strided_slice %54 {offsets = [3, 0], sizes = [1, 256], strides = [1, 1]} : vector<8x256xf32> to vector<1x256xf32>
    %75 = vector.broadcast %73 : vector<8x1xf32> to vector<8x256xf32>
    %76 = vector.broadcast %74 : vector<1x256xf32> to vector<8x256xf32>
    %77 = arith.mulf %75, %76 : vector<8x256xf32>
    %78 = arith.addf %72, %77 : vector<8x256xf32>
    %79 = vector.extract_strided_slice %23 {offsets = [0, 4], sizes = [8, 1], strides = [1, 1]} : vector<8x8xf32> to vector<8x1xf32>
    %80 = vector.extract_strided_slice %54 {offsets = [4, 0], sizes = [1, 256], strides = [1, 1]} : vector<8x256xf32> to vector<1x256xf32>
    %81 = vector.broadcast %79 : vector<8x1xf32> to vector<8x256xf32>
    %82 = vector.broadcast %80 : vector<1x256xf32> to vector<8x256xf32>
    %83 = arith.mulf %81, %82 : vector<8x256xf32>
    %84 = arith.addf %78, %83 : vector<8x256xf32>
    %85 = vector.extract_strided_slice %23 {offsets = [0, 5], sizes = [8, 1], strides = [1, 1]} : vector<8x8xf32> to vector<8x1xf32>
    %86 = vector.extract_strided_slice %54 {offsets = [5, 0], sizes = [1, 256], strides = [1, 1]} : vector<8x256xf32> to vector<1x256xf32>
    %87 = vector.broadcast %85 : vector<8x1xf32> to vector<8x256xf32>
    %88 = vector.broadcast %86 : vector<1x256xf32> to vector<8x256xf32>
    %89 = arith.mulf %87, %88 : vector<8x256xf32>
    %90 = arith.addf %84, %89 : vector<8x256xf32>
    %91 = vector.extract_strided_slice %23 {offsets = [0, 6], sizes = [8, 1], strides = [1, 1]} : vector<8x8xf32> to vector<8x1xf32>
    %92 = vector.extract_strided_slice %54 {offsets = [6, 0], sizes = [1, 256], strides = [1, 1]} : vector<8x256xf32> to vector<1x256xf32>
    %93 = vector.broadcast %91 : vector<8x1xf32> to vector<8x256xf32>
    %94 = vector.broadcast %92 : vector<1x256xf32> to vector<8x256xf32>
    %95 = arith.mulf %93, %94 : vector<8x256xf32>
    %96 = arith.addf %90, %95 : vector<8x256xf32>
    %97 = vector.extract_strided_slice %23 {offsets = [0, 7], sizes = [8, 1], strides = [1, 1]} : vector<8x8xf32> to vector<8x1xf32>
    %98 = vector.extract_strided_slice %54 {offsets = [7, 0], sizes = [1, 256], strides = [1, 1]} : vector<8x256xf32> to vector<1x256xf32>
    %99 = vector.broadcast %97 : vector<8x1xf32> to vector<8x256xf32>
    %100 = vector.broadcast %98 : vector<1x256xf32> to vector<8x256xf32>
    %101 = arith.mulf %99, %100 : vector<8x256xf32>
    %102 = arith.addf %96, %101 : vector<8x256xf32>
    %103 = vector.broadcast %55 : vector<8x1xf32> to vector<8x256xf32>
    %104 = arith.addf %102, %103 : vector<8x256xf32>
    %105 = arith.addf %21, %104 : vector<8x256xf32>
    %106 = vector.extract_strided_slice %1 {offsets = [0, 7], sizes = [8, 1], strides = [1, 1]} : vector<8x12xf32> to vector<8x1xf32>
    %107 = vector.extract_strided_slice %1 {offsets = [0, 8], sizes = [8, 1], strides = [1, 1]} : vector<8x12xf32> to vector<8x1xf32>
    %cst_17 = arith.constant dense<0.000000e+00> : vector<256xf32>
    %108 = vector.multi_reduction <add>, %105, %cst_17 [0] : vector<8x256xf32> to vector<256xf32>
    %109 = vector.shape_cast %108 : vector<256xf32> to vector<1x256xf32>
    %cst_18 = arith.constant 8.000000e+00 : f32
    %110 = vector.broadcast %cst_18 : f32 to vector<1x256xf32>
    %111 = arith.divf %109, %110 : vector<1x256xf32>
    %112 = vector.broadcast %111 : vector<1x256xf32> to vector<8x256xf32>
    %113 = arith.subf %105, %112 : vector<8x256xf32>
    %114 = arith.mulf %113, %113 : vector<8x256xf32>
    %cst_19 = arith.constant dense<0.000000e+00> : vector<256xf32>
    %115 = vector.multi_reduction <add>, %114, %cst_19 [0] : vector<8x256xf32> to vector<256xf32>
    %116 = vector.shape_cast %115 : vector<256xf32> to vector<1x256xf32>
    %cst_20 = arith.constant 8.000000e+00 : f32
    %117 = vector.broadcast %cst_20 : f32 to vector<1x256xf32>
    %118 = arith.divf %116, %117 : vector<1x256xf32>
    %cst_21 = arith.constant 9.99999974E-6 : f32
    %119 = vector.broadcast %cst_21 : f32 to vector<1x256xf32>
    %120 = arith.addf %118, %119 : vector<1x256xf32>
    %121 = math.rsqrt %120 : vector<1x256xf32>
    %122 = vector.broadcast %121 : vector<1x256xf32> to vector<8x256xf32>
    %123 = arith.mulf %113, %122 : vector<8x256xf32>
    %124 = vector.broadcast %106 : vector<8x1xf32> to vector<8x256xf32>
    %125 = arith.mulf %123, %124 : vector<8x256xf32>
    %126 = vector.broadcast %107 : vector<8x1xf32> to vector<8x256xf32>
    %127 = arith.addf %125, %126 : vector<8x256xf32>
    %cst_22 = arith.constant 0.000000e+00 : f32
    %128 = vector.broadcast %cst_22 : f32 to vector<8x256xf32>
    %129 = arith.maximumf %127, %128 : vector<8x256xf32>
    %130 = vector.extract_strided_slice %1 {offsets = [0, 9], sizes = [8, 1], strides = [1, 1]} : vector<8x12xf32> to vector<8x1xf32>
    %131 = vector.extract_strided_slice %25 {offsets = [0, 0], sizes = [8, 1], strides = [1, 1]} : vector<8x8xf32> to vector<8x1xf32>
    %132 = vector.extract_strided_slice %129 {offsets = [0, 0], sizes = [1, 256], strides = [1, 1]} : vector<8x256xf32> to vector<1x256xf32>
    %133 = vector.broadcast %131 : vector<8x1xf32> to vector<8x256xf32>
    %134 = vector.broadcast %132 : vector<1x256xf32> to vector<8x256xf32>
    %135 = arith.mulf %133, %134 : vector<8x256xf32>
    %136 = vector.extract_strided_slice %25 {offsets = [0, 1], sizes = [8, 1], strides = [1, 1]} : vector<8x8xf32> to vector<8x1xf32>
    %137 = vector.extract_strided_slice %129 {offsets = [1, 0], sizes = [1, 256], strides = [1, 1]} : vector<8x256xf32> to vector<1x256xf32>
    %138 = vector.broadcast %136 : vector<8x1xf32> to vector<8x256xf32>
    %139 = vector.broadcast %137 : vector<1x256xf32> to vector<8x256xf32>
    %140 = arith.mulf %138, %139 : vector<8x256xf32>
    %141 = arith.addf %135, %140 : vector<8x256xf32>
    %142 = vector.extract_strided_slice %25 {offsets = [0, 2], sizes = [8, 1], strides = [1, 1]} : vector<8x8xf32> to vector<8x1xf32>
    %143 = vector.extract_strided_slice %129 {offsets = [2, 0], sizes = [1, 256], strides = [1, 1]} : vector<8x256xf32> to vector<1x256xf32>
    %144 = vector.broadcast %142 : vector<8x1xf32> to vector<8x256xf32>
    %145 = vector.broadcast %143 : vector<1x256xf32> to vector<8x256xf32>
    %146 = arith.mulf %144, %145 : vector<8x256xf32>
    %147 = arith.addf %141, %146 : vector<8x256xf32>
    %148 = vector.extract_strided_slice %25 {offsets = [0, 3], sizes = [8, 1], strides = [1, 1]} : vector<8x8xf32> to vector<8x1xf32>
    %149 = vector.extract_strided_slice %129 {offsets = [3, 0], sizes = [1, 256], strides = [1, 1]} : vector<8x256xf32> to vector<1x256xf32>
    %150 = vector.broadcast %148 : vector<8x1xf32> to vector<8x256xf32>
    %151 = vector.broadcast %149 : vector<1x256xf32> to vector<8x256xf32>
    %152 = arith.mulf %150, %151 : vector<8x256xf32>
    %153 = arith.addf %147, %152 : vector<8x256xf32>
    %154 = vector.extract_strided_slice %25 {offsets = [0, 4], sizes = [8, 1], strides = [1, 1]} : vector<8x8xf32> to vector<8x1xf32>
    %155 = vector.extract_strided_slice %129 {offsets = [4, 0], sizes = [1, 256], strides = [1, 1]} : vector<8x256xf32> to vector<1x256xf32>
    %156 = vector.broadcast %154 : vector<8x1xf32> to vector<8x256xf32>
    %157 = vector.broadcast %155 : vector<1x256xf32> to vector<8x256xf32>
    %158 = arith.mulf %156, %157 : vector<8x256xf32>
    %159 = arith.addf %153, %158 : vector<8x256xf32>
    %160 = vector.extract_strided_slice %25 {offsets = [0, 5], sizes = [8, 1], strides = [1, 1]} : vector<8x8xf32> to vector<8x1xf32>
    %161 = vector.extract_strided_slice %129 {offsets = [5, 0], sizes = [1, 256], strides = [1, 1]} : vector<8x256xf32> to vector<1x256xf32>
    %162 = vector.broadcast %160 : vector<8x1xf32> to vector<8x256xf32>
    %163 = vector.broadcast %161 : vector<1x256xf32> to vector<8x256xf32>
    %164 = arith.mulf %162, %163 : vector<8x256xf32>
    %165 = arith.addf %159, %164 : vector<8x256xf32>
    %166 = vector.extract_strided_slice %25 {offsets = [0, 6], sizes = [8, 1], strides = [1, 1]} : vector<8x8xf32> to vector<8x1xf32>
    %167 = vector.extract_strided_slice %129 {offsets = [6, 0], sizes = [1, 256], strides = [1, 1]} : vector<8x256xf32> to vector<1x256xf32>
    %168 = vector.broadcast %166 : vector<8x1xf32> to vector<8x256xf32>
    %169 = vector.broadcast %167 : vector<1x256xf32> to vector<8x256xf32>
    %170 = arith.mulf %168, %169 : vector<8x256xf32>
    %171 = arith.addf %165, %170 : vector<8x256xf32>
    %172 = vector.extract_strided_slice %25 {offsets = [0, 7], sizes = [8, 1], strides = [1, 1]} : vector<8x8xf32> to vector<8x1xf32>
    %173 = vector.extract_strided_slice %129 {offsets = [7, 0], sizes = [1, 256], strides = [1, 1]} : vector<8x256xf32> to vector<1x256xf32>
    %174 = vector.broadcast %172 : vector<8x1xf32> to vector<8x256xf32>
    %175 = vector.broadcast %173 : vector<1x256xf32> to vector<8x256xf32>
    %176 = arith.mulf %174, %175 : vector<8x256xf32>
    %177 = arith.addf %171, %176 : vector<8x256xf32>
    %178 = vector.broadcast %130 : vector<8x1xf32> to vector<8x256xf32>
    %179 = arith.addf %177, %178 : vector<8x256xf32>
    %180 = arith.addf %105, %179 : vector<8x256xf32>
    %181 = vector.extract_strided_slice %1 {offsets = [0, 10], sizes = [8, 1], strides = [1, 1]} : vector<8x12xf32> to vector<8x1xf32>
    %182 = vector.extract_strided_slice %1 {offsets = [0, 11], sizes = [8, 1], strides = [1, 1]} : vector<8x12xf32> to vector<8x1xf32>
    %cst_23 = arith.constant dense<0.000000e+00> : vector<256xf32>
    %183 = vector.multi_reduction <add>, %180, %cst_23 [0] : vector<8x256xf32> to vector<256xf32>
    %184 = vector.shape_cast %183 : vector<256xf32> to vector<1x256xf32>
    %cst_24 = arith.constant 8.000000e+00 : f32
    %185 = vector.broadcast %cst_24 : f32 to vector<1x256xf32>
    %186 = arith.divf %184, %185 : vector<1x256xf32>
    %187 = vector.broadcast %186 : vector<1x256xf32> to vector<8x256xf32>
    %188 = arith.subf %180, %187 : vector<8x256xf32>
    %189 = arith.mulf %188, %188 : vector<8x256xf32>
    %cst_25 = arith.constant dense<0.000000e+00> : vector<256xf32>
    %190 = vector.multi_reduction <add>, %189, %cst_25 [0] : vector<8x256xf32> to vector<256xf32>
    %191 = vector.shape_cast %190 : vector<256xf32> to vector<1x256xf32>
    %cst_26 = arith.constant 8.000000e+00 : f32
    %192 = vector.broadcast %cst_26 : f32 to vector<1x256xf32>
    %193 = arith.divf %191, %192 : vector<1x256xf32>
    %cst_27 = arith.constant 9.99999974E-6 : f32
    %194 = vector.broadcast %cst_27 : f32 to vector<1x256xf32>
    %195 = arith.addf %193, %194 : vector<1x256xf32>
    %196 = math.rsqrt %195 : vector<1x256xf32>
    %197 = vector.broadcast %196 : vector<1x256xf32> to vector<8x256xf32>
    %198 = arith.mulf %188, %197 : vector<8x256xf32>
    %199 = vector.broadcast %181 : vector<8x1xf32> to vector<8x256xf32>
    %200 = arith.mulf %198, %199 : vector<8x256xf32>
    %201 = vector.broadcast %182 : vector<8x1xf32> to vector<8x256xf32>
    %202 = arith.addf %200, %201 : vector<8x256xf32>
    %cst_28 = arith.constant 0.000000e+00 : f32
    %203 = vector.broadcast %cst_28 : f32 to vector<8x256xf32>
    %204 = arith.maximumf %202, %203 : vector<8x256xf32>
    %205 = vector.extract_strided_slice %27 {offsets = [0, 0], sizes = [8, 1], strides = [1, 1]} : vector<8x8xf32> to vector<8x1xf32>
    %206 = vector.extract_strided_slice %204 {offsets = [0, 0], sizes = [1, 256], strides = [1, 1]} : vector<8x256xf32> to vector<1x256xf32>
    %207 = vector.broadcast %205 : vector<8x1xf32> to vector<8x256xf32>
    %208 = vector.broadcast %206 : vector<1x256xf32> to vector<8x256xf32>
    %209 = arith.mulf %207, %208 : vector<8x256xf32>
    %210 = vector.extract_strided_slice %27 {offsets = [0, 1], sizes = [8, 1], strides = [1, 1]} : vector<8x8xf32> to vector<8x1xf32>
    %211 = vector.extract_strided_slice %204 {offsets = [1, 0], sizes = [1, 256], strides = [1, 1]} : vector<8x256xf32> to vector<1x256xf32>
    %212 = vector.broadcast %210 : vector<8x1xf32> to vector<8x256xf32>
    %213 = vector.broadcast %211 : vector<1x256xf32> to vector<8x256xf32>
    %214 = arith.mulf %212, %213 : vector<8x256xf32>
    %215 = arith.addf %209, %214 : vector<8x256xf32>
    %216 = vector.extract_strided_slice %27 {offsets = [0, 2], sizes = [8, 1], strides = [1, 1]} : vector<8x8xf32> to vector<8x1xf32>
    %217 = vector.extract_strided_slice %204 {offsets = [2, 0], sizes = [1, 256], strides = [1, 1]} : vector<8x256xf32> to vector<1x256xf32>
    %218 = vector.broadcast %216 : vector<8x1xf32> to vector<8x256xf32>
    %219 = vector.broadcast %217 : vector<1x256xf32> to vector<8x256xf32>
    %220 = arith.mulf %218, %219 : vector<8x256xf32>
    %221 = arith.addf %215, %220 : vector<8x256xf32>
    %222 = vector.extract_strided_slice %27 {offsets = [0, 3], sizes = [8, 1], strides = [1, 1]} : vector<8x8xf32> to vector<8x1xf32>
    %223 = vector.extract_strided_slice %204 {offsets = [3, 0], sizes = [1, 256], strides = [1, 1]} : vector<8x256xf32> to vector<1x256xf32>
    %224 = vector.broadcast %222 : vector<8x1xf32> to vector<8x256xf32>
    %225 = vector.broadcast %223 : vector<1x256xf32> to vector<8x256xf32>
    %226 = arith.mulf %224, %225 : vector<8x256xf32>
    %227 = arith.addf %221, %226 : vector<8x256xf32>
    %228 = vector.extract_strided_slice %27 {offsets = [0, 4], sizes = [8, 1], strides = [1, 1]} : vector<8x8xf32> to vector<8x1xf32>
    %229 = vector.extract_strided_slice %204 {offsets = [4, 0], sizes = [1, 256], strides = [1, 1]} : vector<8x256xf32> to vector<1x256xf32>
    %230 = vector.broadcast %228 : vector<8x1xf32> to vector<8x256xf32>
    %231 = vector.broadcast %229 : vector<1x256xf32> to vector<8x256xf32>
    %232 = arith.mulf %230, %231 : vector<8x256xf32>
    %233 = arith.addf %227, %232 : vector<8x256xf32>
    %234 = vector.extract_strided_slice %27 {offsets = [0, 5], sizes = [8, 1], strides = [1, 1]} : vector<8x8xf32> to vector<8x1xf32>
    %235 = vector.extract_strided_slice %204 {offsets = [5, 0], sizes = [1, 256], strides = [1, 1]} : vector<8x256xf32> to vector<1x256xf32>
    %236 = vector.broadcast %234 : vector<8x1xf32> to vector<8x256xf32>
    %237 = vector.broadcast %235 : vector<1x256xf32> to vector<8x256xf32>
    %238 = arith.mulf %236, %237 : vector<8x256xf32>
    %239 = arith.addf %233, %238 : vector<8x256xf32>
    %240 = vector.extract_strided_slice %27 {offsets = [0, 6], sizes = [8, 1], strides = [1, 1]} : vector<8x8xf32> to vector<8x1xf32>
    %241 = vector.extract_strided_slice %204 {offsets = [6, 0], sizes = [1, 256], strides = [1, 1]} : vector<8x256xf32> to vector<1x256xf32>
    %242 = vector.broadcast %240 : vector<8x1xf32> to vector<8x256xf32>
    %243 = vector.broadcast %241 : vector<1x256xf32> to vector<8x256xf32>
    %244 = arith.mulf %242, %243 : vector<8x256xf32>
    %245 = arith.addf %239, %244 : vector<8x256xf32>
    %246 = vector.extract_strided_slice %27 {offsets = [0, 7], sizes = [8, 1], strides = [1, 1]} : vector<8x8xf32> to vector<8x1xf32>
    %247 = vector.extract_strided_slice %204 {offsets = [7, 0], sizes = [1, 256], strides = [1, 1]} : vector<8x256xf32> to vector<1x256xf32>
    %248 = vector.broadcast %246 : vector<8x1xf32> to vector<8x256xf32>
    %249 = vector.broadcast %247 : vector<1x256xf32> to vector<8x256xf32>
    %250 = arith.mulf %248, %249 : vector<8x256xf32>
    %251 = arith.addf %245, %250 : vector<8x256xf32>
    %252 = vector.broadcast %30 : vector<8x1xf32> to vector<8x256xf32>
    %253 = arith.addf %251, %252 : vector<8x256xf32>
    %c0_29 = arith.constant 0 : index
    %c0_30 = arith.constant 0 : index
    %254 = vector.load %arg4[%c0_29, %c0_30] : memref<8x256xf32, #tpu.memory_space<vmem>>, vector<8x256xf32>
    tpu.vector_store %arg4[%c0_29, %c0_30], %253 {strides = array<i32>} : memref<8x256xf32, #tpu.memory_space<vmem>>, vector<8x256xf32>,
    return
  }
  func.func @transform_0(%arg0: i32) -> (i32, i32) {
    %c0_i32 = arith.constant 0 : i32
    %c0_i32_0 = arith.constant 0 : i32
    return %c0_i32, %arg0 : i32, i32
  }
  func.func @transform_1(%arg0: i32) -> (i32, i32) {
    %c0_i32 = arith.constant 0 : i32
    %c0_i32_0 = arith.constant 0 : i32
    %c0_i32_1 = arith.constant 0 : i32
    return %c0_i32, %c0_i32_0 : i32, i32
  }
  func.func @transform_2(%arg0: i32) -> (i32, i32, i32) {
    %c0_i32 = arith.constant 0 : i32
    %c0_i32_0 = arith.constant 0 : i32
    %c0_i32_1 = arith.constant 0 : i32
    %c0_i32_2 = arith.constant 0 : i32
    return %c0_i32, %c0_i32_0, %c0_i32_1 : i32, i32, i32
  }
  func.func @transform_3(%arg0: i32) -> (i32, i32) {
    %c0_i32 = arith.constant 0 : i32
    %c0_i32_0 = arith.constant 0 : i32
    return %c0_i32, %arg0 : i32, i32
  }
}

</mosaic_0001>

<bundles_post_ra>
// kernel: tpu_custom_call.1
= control target key start
LH: loop header
LB: loop body
LE: loop exit
PB: predicated region body
PF: predicated region fallthrough
CT: control target
= control target key end

     0   :  { %8 = vsyncpa [#allocation3], 0  ;;  %s1458_s0 = inlined_call_operand.hbm [shape: f32[3,512], index: 0, kind: input, shape index: {}]   ;;  %s1459_s1 = inlined_call_operand.hbm [shape: f32[8,12], index: 1, kind: input, shape index: {}]   ;;  %s1460_s2 = inlined_call_operand.hbm [shape: f32[4,8,8], index: 2, kind: input, shape index: {}]   ;;  %s1461_s3 = inlined_call_operand.hbm [shape: f32[8,512], index: 3, kind: output, shape index: {}]  }
   0x1   :  { %10 = vsyncpa [#allocation3 + $0x1], 0 }
   0x2   :  { %11 = vsyncpa [#allocation6], 0 }
   0x3   :  { %12 = vsyncpa [#allocation4], 0 }
   0x4   :  { %14 = vsyncpa [#allocation4 + $0x1], 0  ;;  %s1217_s12 = smov 0   ;;  %s1219_s13 = smov 0  }
   0x5   :  { %s1221_s14 = smov 0   ;;  %s1223_s15 = smov 0  }
   0x6 LB: > { %s1238_s16 = sadd.s32 4294967295, %s1178_s15   ;;  %s864_s17 = sadd.s32 4294967294, %s1178_s15   ;;  %s1178_s15 = sphi %s1223_s15, %s1471_s15   ;;  %s1174_s14 = sphi %s1221_s14, %s1470_s14   ;;  %s1170_s13 = sphi %s1219_s13, %s1469_s13   ;;  %s1166_s12 = sphi %s1217_s12, %s1468_s12  }
   0x7   : > { %p40_p0 = scmp.ne.s32.totalorder %s1170_s13, %s1166_s12  ;;  %p41_p1 = scmp.eq.s32.totalorder %s1238_s16, 0 }
   0x8   : > { %p106_p2 = scmp.eq.s32.totalorder %s1238_s16, 1  ;;  %p112_p3 = scmp.eq.s32.totalorder %s864_s17, 1 }
   0x9   : > { %p1247_p4 = por %p41_p1, %p40_p0  ;;  %p865_p5 = scmp.ge.s32.totalorder %s1178_s15, 1 }
   0xa   : > { %p1252_p6 = por %p112_p3, %p40_p0  ;;  %p119_p7 = scmp.lt.s32.totalorder %s1178_s15, 3 }
   0xb   : > { %s131_s22 = sshll.u32 %s1459_s1, 4  ;;  %s1180_s24 = smov [#allocation5]   ;;  %s132_s22 = int_to_ptr.hbm [resolvable:$true] %s131_s22 }
   0xc   : > { %p1260_p8 = pnand %p865_p5, %p119_p7  ;;  %s133_s25 = sshll.u32 %s1180_s24, 4  ;;  %s134_s25 = int_to_ptr.vmem [resolvable:$true] %s133_s25 }
   0xd   : > { %s142_s28 = sshll.u32 %s1460_s2, 4  ;;  %s1181_s29 = smov [#allocation7]   ;;  %s143_s28 = int_to_ptr.hbm [resolvable:$true] %s142_s28 }
   0xe   : > { %p896_p10 = pneg %p1260_p8  ;;  %s144_s30 = sshll.u32 %s1181_s29, 4  ;;  %s145_s30 = int_to_ptr.vmem [resolvable:$true] %s144_s30 }
   0xf   : > { %s1182_s4 = smov 128   ;;  %s1183_s5 = smov 8  }
  0x10   : > { %p897_p11 = pnand %p896_p10, %p41_p1  ;;  %s1273_s6 = sadd.s32 1, %s1178_s15  }
  0x11   : > { %s24_s7 = ssub.s32 %s1178_s15, %s1273_s6  ;;  %s27_s8 = sadd.s32 1, %s1174_s14 }
  0x12   : > { %899 = dma.hbm_to_vmem [thread:$0]  (!%p897_p11), %s132_s22, 128, %s134_s25, [#allocation6]  }
  0x13   : > { %902 = dma.hbm_to_vmem [thread:$0]  (!%p897_p11), %s143_s28, 512, %s145_s30, [#allocation6], %s1182_s4, %s1182_s4, %s1183_s5  }
  0x14   : > { %p25_p12 = scmp.eq.s32.totalorder %s24_s7, 0  ;;  %p34_p13 = scmp.ne.s32.totalorder %s1174_s14, %s1170_s13 }
  0x15   : > { %p35_p0 = scmp.eq.s32.totalorder %s1178_s15, 0  ;;  %p913_p7 = scmp.lt.s32.totalorder %s1178_s15, 2 }
  0x16   : > { %s1282_s9 = scalar_select %p25_p12, %s1174_s14, %s27_s8  }
  0x17   : > { %p36_p3 = por %p35_p0, %p34_p13  ;;  %p1286_p5 = por %p106_p2, %p34_p13 }
  0x18   : > { %s158_s11 = sand.u32 1, %s1174_s14   ;;  %s882_s20 = sshll.u32 %s1178_s15, 3 }
  0x19   : > { %s869_s17 = sshll.u32 %s158_s11, 3  ;;  %s167_s24 = scalar_lea.hbm %s1458_s0, %s882_s20 }
  0x1a   : > { %s162_s25 = scalar_lea.vmem [#allocation2], %s869_s17  ;;  %s169_s27 = sshll.u32 %s167_s24, 4  ;;  %s170_s27 = int_to_ptr.hbm [resolvable:$true] %s169_s27 }
  0x1b   : > { %s171_s26 = sshll.u32 %s162_s25, 4  ;;  %p1296_p10 = pnand %p913_p7, %p36_p3  ;;  %s172_s26 = int_to_ptr.vmem [resolvable:$true] %s171_s26 }
  0x1c   : > { %s159_s29 = scalar_lea.sflag [#allocation3], %s158_s11  ;;  %s1078_s30 = sshra.s32 %s170_s27, 4  ;;  %s1079_s30 = int_to_ptr.hbm [resolvable:$true] %s1078_s30 }
  0x1d   : > { %s1080_s4 = scalar_lea.hbm %s1079_s30, 8  ;;  %p1082_p11 = pneg %p1296_p10 }
  0x1e   : > { %p1081_p2 = scmp.ne.s32.totalorder %s1079_s30, %s1080_s4  ;;  %s1085_s8 = scalar_lea.hbm %s1458_s0, 16 }
  0x1f   : > { %p1086_p0 = scmp.lt.s32.totalorder %s1079_s30, %s1458_s0  ;;  %p1087_p3 = scmp.lt.s32.totalorder %s1085_s8, %s1080_s4 }
  0x20   : > { %p1083_p12 = pnand %p1082_p11, %p1081_p2 }
  0x21   : > { %p1088_p7 = por %p1087_p3, %p1086_p0 }
  0x22   : > { %p1084_p13 = pneg %p1083_p12 }
  0x24   : > { %p1089_p9 = pnand %p1088_p7, %p1084_p13 }
  0x26   : > { %1092 = shalt.err (!%p1089_p9)
}
  0x27   : > { %906 = dma.hbm_to_vmem [thread:$0]  (!%p1296_p10), %s170_s27, 128, %s172_s26, %s159_s29  }
  0x28   : > { %180 = sbr.rel (%p1260_p8) target bundleno = 430 (0x1ae), region = 32  ;;  %s1313_s11 = sand.u32 (!%p1260_p8), 1, %s1170_s13  }
  0x29   : > { %s873_s21 = sshll.u32 (!%p1260_p8), %s1313_s11, 3  ;;  %s183_s22 = scalar_lea.sflag (!%p1260_p8), [#allocation3], %s1313_s11 }
  0x2a   : > { %s1317_s24 = scalar_lea.vmem (!%p1260_p8), [#allocation2], %s873_s21 }
  0x2d   : > { %1153 = dma.done.wait (%p1247_p4), %s183_s22, 128  }
  0x2e   : > { %1155 = vsyncadd (%p1247_p4), %s183_s22, 4294967168 }
  0x2f   : > { %1157 = dma.done.wait (%p41_p1), [#allocation6], 640  }
  0x30   : > { %1159 = vsyncadd (%p41_p1), [#allocation6], 4294966656  ;;  %v1184_v0 = vmov 0   ;;  %v1185_v1 = vmov 2   ;;  %v1186_v2 = vmov 4   ;;  %v1330_v3 = vld [vmem:[#allocation5] sm:$0xff] }
  0x31   : > { %966 = vset.pattern.permute.xlu0 %v1184_v0  ;;  %968 = vset.pattern.permute.xlu1 %v1185_v1  ;;  %v1187_v4 = vmov 1   ;;  %v1188_v5 = vmov 3   ;;  %v1189_v6 = vmov 5   ;;  %v272_v7 = vld [vmem:[#allocation7] sm:$0xff]  ;;  %v1190_v8 = vmov 7   ;;  %v274_v11 = vld [vmem:[#allocation7 + $0x8] sm:$0xff] }
  0x32   : > { %970 = vset.pattern.permute.xlu2 %v1186_v2  ;;  %226 = vperm.xlu0 %966, %v1330_v3   ;;  %v1191_v9 = vmov 6   ;;  %v1192_v10 = vmov 8   ;;  %v222_v12 = vld [vmem:[%s1317_s24] sm:$0x77]  ;;  %v1193_v18 = vmov 8.0   ;;  %s876_s18 = sshll.u32 %s1313_s11, 4 }
  0x33   : > { %253 = vperm.xlu1 %968, %v1330_v3   ;;  %343 = vperm.xlu2 %970, %v1330_v3   ;;  %v230_v14 = vperm.slane %v222_v12, 0  ;;  %v231_v15 = vperm.slane %v222_v12, 4  ;;  %v242_v16 = vperm.slane %v222_v12, 1  ;;  %v243_v17 = vperm.slane %v222_v12, 5  ;;  %s883_s23 = sshll.u32 %s1238_s16, 4  ;;  %s219_s28 = scalar_lea.vmem [#allocation8], %s876_s18 }
  0x34   : > { %1004 = vrcp.f32 %v1193_v18  ;;  %v256_v20 = vperm.slane %v222_v12, 2  ;;  %v257_v21 = vperm.slane %v222_v12, 6  ;;  %s770_s27 = scalar_lea.hbm %s1461_s3, %s883_s23  ;;  %s772_s16 = sshll.u32 %s219_s28, 4  ;;  %s773_s16 = int_to_ptr.vmem [resolvable:$true] %s772_s16 }
  0x35   : > { %v234_v22 = vperm.slane %v230_v14, 0  ;;  %v235_v23 = vperm.slane %v231_v15, 0  ;;  %v246_v24 = vperm.slane %v242_v16, 1  ;;  %v247_v25 = vperm.slane %v243_v17, 1  ;;  %s774_s29 = sshll.u32 %s770_s27, 4  ;;  %s759_s30 = scalar_lea.sflag [#allocation4], %s1313_s11  ;;  %s775_s29 = int_to_ptr.hbm [resolvable:$true] %s774_s29 }
  0x36   : > { %v260_v27 = vperm.slane %v256_v20, 2  ;;  %v261_v28 = vperm.slane %v257_v21, 2  ;;  %s1122_s4 = sshra.s32 %s775_s29, 4  ;;  %s1128_s17 = scalar_lea.hbm %s1461_s3, 32  ;;  %s1123_s4 = int_to_ptr.hbm [resolvable:$true] %s1122_s4 }
  0x37   : > { %s1124_s5 = scalar_lea.hbm %s1123_s4, 16  ;;  %p1129_p9 = scmp.lt.s32.totalorder %s1123_s4, %s1461_s3 }
  0x38   : > { %p1125_p1 = scmp.ne.s32.totalorder %s1123_s4, %s1124_s5  ;;  %p1130_p10 = scmp.lt.s32.totalorder %s1128_s17, %s1124_s5 }
  0x3a   : > { %967 = vset.pattern.permute.xlu0 %v1187_v4  ;;  %v1005_v26 = vpop.eup %1004  ;;  %p1126_p4 = pnand %p1125_p1, %p1286_p5  ;;  %p1131_p2 = por %p1130_p10, %p1129_p9 }
  0x3b   : > { %969 = vset.pattern.permute.xlu1 %v1188_v5  ;;  %239 = vperm.xlu0 %967, %v1330_v3   ;;  %v292_v34 = vmul.f32 8.0, %v1005_v26  ;;  %vm296_vm0 = vweird.f32 %v1005_v26 }
  0x3c   : > { %267 = vperm.xlu1 %969, %v1330_v3   ;;  %971 = vset.pattern.permute.xlu2 %v1189_v6  ;;  %p1127_p8 = pneg %p1126_p4 }
  0x3d   : > { %349 = vperm.xlu2 %971, %v1330_v3   ;;  %v293_v42 = vsub.f32 1.0, %v292_v34  ;;  %v1194_v34 = vmov 9  }
  0x3e   : > { %p1132_p11 = pnand %p1131_p2, %p1127_p8 }
  0x3f   : > { %v294_v47 = vmul.f32 %v1005_v26, %v293_v42 }
  0x41   : > { %v295_v52 = vadd.f32 %v1005_v26, %v294_v47 }
  0x43   : > { %974 = vset.pattern.permute.xlu0 %v1185_v1  ;;  %v1372_v57 = vsel %vm296_vm0, %v1005_v26, %v295_v52 }
  0x44   : > { %972 = vset.pattern.permute.xlu1 %v1184_v0  ;;  %376 = vperm.xlu0 %974, %v272_v7  }
  0x45   : > { %358 = vperm.xlu1 %972, %v272_v7   ;;  %973 = vset.pattern.permute.xlu2 %v1187_v4 }
  0x46   : > { %366 = vperm.xlu2 %973, %v272_v7  }
  0x4c   : > { %979 = vset.pattern.permute.xlu0 %v1190_v8 }
  0x4d   : > { %975 = vset.pattern.permute.xlu1 %v1188_v5  ;;  %426 = vperm.xlu0 %979, %v272_v7  }
  0x4e   : > { %386 = vperm.xlu1 %975, %v272_v7   ;;  %976 = vset.pattern.permute.xlu2 %v1186_v2 }
  0x4f   : > { %396 = vperm.xlu2 %976, %v272_v7  }
  0x55   : > { %984 = vset.pattern.permute.xlu0 %v1187_v4 }
  0x56   : > { %977 = vset.pattern.permute.xlu1 %v1189_v6  ;;  %523 = vperm.xlu0 %984, %v274_v11  }
  0x57   : > { %406 = vperm.xlu1 %977, %v272_v7   ;;  %978 = vset.pattern.permute.xlu2 %v1191_v9 }
  0x58   : > { %416 = vperm.xlu2 %978, %v272_v7  }
  0x5e   : > { %989 = vset.pattern.permute.xlu0 %v1191_v9 }
  0x5f   : > { %980 = vset.pattern.permute.xlu1 %v1191_v9  ;;  %573 = vperm.xlu0 %989, %v274_v11  }
  0x60   : > { %436 = vperm.xlu1 %980, %v1330_v3   ;;  %981 = vset.pattern.permute.xlu2 %v1190_v8 }
  0x61   : > { %500 = vperm.xlu2 %981, %v1330_v3  }
  0x67   : > { %994 = vset.pattern.permute.xlu0 %v1184_v0 }
  0x68   : > { %982 = vset.pattern.permute.xlu1 %v1192_v10 }
  0x69   : > { %983 = vset.pattern.permute.xlu2 %v1184_v0  ;;  %506 = vperm.xlu1 %982, %v1330_v3  }
  0x6a   : > { %515 = vperm.xlu2 %983, %v274_v11  }
  0x71   : > { %985 = vset.pattern.permute.xlu1 %v1185_v1 }
  0x72   : > { %533 = vperm.xlu1 %985, %v274_v11   ;;  %986 = vset.pattern.permute.xlu2 %v1188_v5 }
  0x73   : > { %543 = vperm.xlu2 %986, %v274_v11  }
  0x7a   : > { %987 = vset.pattern.permute.xlu1 %v1186_v2 }
  0x7b   : > { %553 = vperm.xlu1 %987, %v274_v11   ;;  %988 = vset.pattern.permute.xlu2 %v1189_v6 }
  0x7c   : > { %563 = vperm.xlu2 %988, %v274_v11  }
  0x83   : > { %990 = vset.pattern.permute.xlu1 %v1190_v8 }
  0x84   : > { %583 = vperm.xlu1 %990, %v274_v11   ;;  %991 = vset.pattern.permute.xlu2 %v1194_v34 }
  0x85   : > { %593 = vperm.xlu2 %991, %v1330_v3  }
  0xa4   : > { %v227_v13 = vpop.permute.xlu0 %226 }
  0xa5   : > { %v254_v19 = vpop.permute.xlu1 %253  ;;  %v236_v30 = vmul.f32 %v234_v22, %v227_v13  ;;  %v237_v31 = vmul.f32 %v235_v23, %v227_v13  ;;  %v344_v23 = vpop.permute.xlu2 %343 }
  0xa6   : > { %v262_v35 = vmul.f32 %v260_v27, %v254_v19  ;;  %v263_v36 = vmul.f32 %v261_v28, %v254_v19 }
  0xad   : > { %v240_v29 = vpop.permute.xlu0 %239 }
  0xae   : > { %v248_v32 = vmul.f32 %v246_v24, %v240_v29  ;;  %v249_v33 = vmul.f32 %v247_v25, %v240_v29  ;;  %v268_v39 = vpop.permute.xlu1 %267  ;;  %v350_v29 = vpop.permute.xlu2 %349 }
  0xb0   : > { %v250_v37 = vadd.f32 %v248_v32, %v236_v30  ;;  %v251_v38 = vadd.f32 %v249_v33, %v237_v31 }
  0xb2   : > { %v264_v40 = vadd.f32 %v262_v35, %v250_v37  ;;  %v265_v41 = vadd.f32 %v263_v36, %v251_v38 }
  0xb4   : > { %v1364_v43 = vadd.f32 %v268_v39, %v264_v40  ;;  %v1366_v44 = vadd.f32 %v268_v39, %v265_v41 }
  0xb6   : > { %v279_v45 = vrot.slane %v1364_v43, 4  ;;  %v285_v46 = vrot.slane %v1366_v44, 4 }
  0xb7   : > { %v359_v40 = vpop.permute.xlu1 %358 }
  0xb8   : > { %v280_v48 = vadd.f32 %v279_v45, %v1364_v43  ;;  %v286_v49 = vadd.f32 %v285_v46, %v1366_v44  ;;  %v367_v45 = vpop.permute.xlu2 %366 }
  0xba   : > { %v281_v50 = vrot.slane %v280_v48, 2  ;;  %v287_v51 = vrot.slane %v286_v49, 2 }
  0xbc   : > { %v282_v53 = vadd.f32 %v281_v50, %v280_v48  ;;  %v288_v54 = vadd.f32 %v287_v51, %v286_v49  ;;  %v1381_v51 = vld [vmem:[#allocation7 + $0x10] sm:$0xff] }
  0xbd   : > { %672 = vperm.xlu0 %994, %v1381_v51  }
  0xbe   : > { %v283_v55 = vrot.slane %v282_v53, 1  ;;  %v289_v56 = vrot.slane %v288_v54, 1 }
  0xc0   : > { %v284_v58 = vadd.f32 %v283_v55, %v282_v53  ;;  %v290_v59 = vadd.f32 %v289_v56, %v288_v54  ;;  %v1195_v53 = vmov 10   ;;  %v1196_v55 = vmov 11  }
  0xc1   : > { %992 = vset.pattern.permute.xlu1 %v1195_v53  ;;  %993 = vset.pattern.permute.xlu2 %v1196_v55 }
  0xc2   : > { %v298_v60 = vmul.f32 %v1372_v57, %v284_v58  ;;  %v299_v61 = vmul.f32 %v1372_v57, %v290_v59  ;;  %657 = vperm.xlu1 %992, %v1330_v3   ;;  %663 = vperm.xlu2 %993, %v1330_v3   ;;  %v387_v59 = vpop.permute.xlu1 %386 }
  0xc4   : > { %v300_v62 = vsub.f32 %v1364_v43, %v298_v60  ;;  %v301_v63 = vsub.f32 %v1366_v44, %v299_v61 }
  0xc5   : > { %999 = vset.pattern.permute.xlu0 %v1189_v6 }
  0xc6   : > { %v302_v7 = vmul.f32 %v300_v62, %v300_v62  ;;  %v303_v10 = vmul.f32 %v301_v63, %v301_v63  ;;  %720 = vperm.xlu0 %999, %v1381_v51  }
  0xc8   : > { %v304_v11 = vrot.slane %v302_v7, 4  ;;  %v310_v12 = vrot.slane %v303_v10, 4 }
  0xca   : > { %v305_v13 = vadd.f32 %v304_v11, %v302_v7  ;;  %v311_v14 = vadd.f32 %v310_v12, %v303_v10  ;;  %995 = vset.pattern.permute.xlu1 %v1187_v4  ;;  %996 = vset.pattern.permute.xlu2 %v1185_v1 }
  0xcb   : > { %680 = vperm.xlu1 %995, %v1381_v51   ;;  %690 = vperm.xlu2 %996, %v1381_v51  }
  0xcc   : > { %v306_v15 = vrot.slane %v305_v13, 2  ;;  %v312_v16 = vrot.slane %v311_v14, 2 }
  0xce   : > { %v307_v17 = vadd.f32 %v306_v15, %v305_v13  ;;  %v313_v18 = vadd.f32 %v312_v16, %v311_v14  ;;  %v377_v16 = vpop.permute.xlu0 %376  ;;  %1003 = vset.pattern.permute.xlu0 %v1184_v0 }
  0xd0   : > { %v308_v19 = vrot.slane %v307_v17, 1  ;;  %v314_v20 = vrot.slane %v313_v18, 1 }
  0xd2   : > { %v309_v21 = vadd.f32 %v308_v19, %v307_v17  ;;  %v315_v22 = vadd.f32 %v314_v20, %v313_v18 }
  0xd3   : > { %997 = vset.pattern.permute.xlu1 %v1188_v5  ;;  %998 = vset.pattern.permute.xlu2 %v1186_v2 }
  0xd4   : > { %v316_v24 = vmul.f32 %v309_v21, %v1372_v57  ;;  %v317_v25 = vmul.f32 %v315_v22, %v1372_v57  ;;  %700 = vperm.xlu1 %997, %v1381_v51   ;;  %710 = vperm.xlu2 %998, %v1381_v51  }
  0xd6   : > { %v318_v26 = vadd.f32 1e-05, %v316_v24  ;;  %v319_v27 = vadd.f32 1e-05, %v317_v25 }
  0xd8   : > { %1006 = vrsqrt.f32 %v318_v26  ;;  %vm326_vm3 = vweird.f32 %v318_v26  ;;  %vm336_vm5 = vweird.f32 %v319_v27 }
  0xd9   : > { %1008 = vrsqrt.f32 %v319_v27 }
  0xdc   : > { %1000 = vset.pattern.permute.xlu1 %v1191_v9  ;;  %1001 = vset.pattern.permute.xlu2 %v1190_v8 }
  0xdd   : > { %730 = vperm.xlu1 %1000, %v1381_v51   ;;  %740 = vperm.xlu2 %1001, %v1381_v51  }
  0xde   : > { %v1007_v28 = vpop.eup %1006 }
  0xdf   : > { %v1009_v30 = vpop.eup %1008  ;;  %v321_v31 = vmul.f32 %v1007_v28, %v318_v26  ;;  %vm327_vm1 = vweird.f32 %v1007_v28 }
  0xe0   : > { %v331_v32 = vmul.f32 %v1009_v30, %v319_v27  ;;  %vm337_vm2 = vweird.f32 %v1009_v30  ;;  %vm328_vm4 = vmor %vm326_vm3, %vm327_vm1 }
  0xe1   : > { %v322_v33 = vmul.f32 %v1007_v28, %v321_v31  ;;  %vm338_vm6 = vmor %vm336_vm5, %vm337_vm2 }
  0xe2   : > { %v332_v35 = vmul.f32 %v1009_v30, %v331_v32 }
  0xe3   : > { %v323_v36 = vmul.f32 0.5, %v322_v33 }
  0xe4   : > { %v333_v37 = vmul.f32 0.5, %v332_v35 }
  0xe5   : > { %v324_v38 = vsub.f32 1.5, %v323_v36  ;;  %1002 = vset.pattern.permute.xlu1 %v1184_v0 }
  0xe6   : > { %v334_v39 = vsub.f32 1.5, %v333_v37 }
  0xe7   : > { %v325_v41 = vmul.f32 %v1007_v28, %v324_v38 }
  0xe8   : > { %v335_v42 = vmul.f32 %v1009_v30, %v334_v39 }
  0xe9   : > { %v329_v46 = vsel %vm328_vm4, %v1007_v28, %v325_v41 }
  0xea   : > { %v339_v47 = vsel %vm338_vm6, %v1009_v30, %v335_v42  ;;  %v340_v48 = vmul.f32 %v329_v46, %v300_v62 }
  0xeb   : > { %v341_v49 = vmul.f32 %v339_v47, %v301_v63  ;;  %v397_v63 = vpop.permute.xlu2 %396 }
  0xec   : > { %v346_v50 = vmul.f32 %v344_v23, %v340_v48 }
  0xed   : > { %v347_v52 = vmul.f32 %v344_v23, %v341_v49 }
  0xee   : > { %v352_v54 = vadd.f32 %v350_v29, %v346_v50 }
  0xef   : > { %v353_v56 = vadd.f32 %v350_v29, %v347_v52  ;;  %v407_v29 = vpop.permute.xlu1 %406 }
  0xf0   : > { %v354_v58 = vmax.f32 %v352_v54, 0.0 }
  0xf1   : > { %v355_v60 = vmax.f32 %v353_v56, 0.0 }
  0xf2   : > { %v369_v61 = vperm.slane %v354_v58, 1  ;;  %v361_v62 = vperm.slane %v354_v58, 0  ;;  %v389_v15 = vperm.slane %v354_v58, 3  ;;  %v379_v19 = vperm.slane %v354_v58, 2 }
  0xf3   : > { %v370_v7 = vperm.slane %v355_v60, 1  ;;  %v362_v10 = vperm.slane %v355_v60, 0  ;;  %v390_v18 = vperm.slane %v355_v60, 3  ;;  %v380_v3 = vperm.slane %v355_v60, 2  ;;  %v417_v35 = vpop.permute.xlu2 %416 }
  0xf4   : > { %v371_v11 = vmul.f32 %v369_v61, %v367_v45  ;;  %v363_v12 = vmul.f32 %v361_v62, %v359_v40  ;;  %v399_v21 = vperm.slane %v354_v58, 4  ;;  %v400_v22 = vperm.slane %v355_v60, 4 }
  0xf5   : > { %v372_v13 = vmul.f32 %v370_v7, %v367_v45  ;;  %v364_v14 = vmul.f32 %v362_v10, %v359_v40  ;;  %v381_v23 = vmul.f32 %v379_v19, %v377_v16  ;;  %v382_v24 = vmul.f32 %v380_v3, %v377_v16  ;;  %v427_v45 = vpop.permute.xlu0 %426 }
  0xf6   : > { %v373_v17 = vadd.f32 %v371_v11, %v363_v12  ;;  %v391_v6 = vmul.f32 %v389_v15, %v387_v59  ;;  %v409_v25 = vperm.slane %v354_v58, 5  ;;  %v392_v26 = vmul.f32 %v390_v18, %v387_v59  ;;  %v278_v18 = vld [vmem:[#allocation7 + $0x18] sm:$0xff] }
  0xf7   : > { %v374_v20 = vadd.f32 %v372_v13, %v364_v14  ;;  %v410_v4 = vperm.slane %v355_v60, 5  ;;  %v401_v30 = vmul.f32 %v399_v21, %v397_v63  ;;  %v419_v31 = vperm.slane %v354_v58, 6  ;;  %v437_v54 = vpop.permute.xlu1 %436  ;;  %751 = vperm.xlu1 %1002, %v278_v18  }
  0xf8   : > { %v383_v27 = vadd.f32 %v381_v23, %v373_v17  ;;  %v402_v32 = vmul.f32 %v400_v22, %v397_v63  ;;  %v420_v36 = vperm.slane %v355_v60, 6  ;;  %v411_v1 = vmul.f32 %v409_v25, %v407_v29 }
  0xf9   : > { %v384_v28 = vadd.f32 %v382_v24, %v374_v20  ;;  %v429_v37 = vperm.slane %v354_v58, 7  ;;  %v412_v40 = vmul.f32 %v410_v4, %v407_v29  ;;  %v430_v41 = vperm.slane %v355_v60, 7 }
  0xfa   : > { %v393_v33 = vadd.f32 %v391_v6, %v383_v27  ;;  %v421_v42 = vmul.f32 %v419_v31, %v417_v35  ;;  %v422_v46 = vmul.f32 %v420_v36, %v417_v35 }
  0xfb   : > { %v394_v34 = vadd.f32 %v392_v26, %v384_v28  ;;  %v431_v49 = vmul.f32 %v429_v37, %v427_v45  ;;  %v432_v50 = vmul.f32 %v430_v41, %v427_v45 }
  0xfc   : > { %v403_v38 = vadd.f32 %v401_v30, %v393_v33  ;;  %v501_v33 = vpop.permute.xlu2 %500 }
  0xfd   : > { %v404_v39 = vadd.f32 %v402_v32, %v394_v34 }
  0xfe   : > { %v413_v47 = vadd.f32 %v411_v1, %v403_v38 }
  0xff   : > { %v414_v48 = vadd.f32 %v412_v40, %v404_v39  ;;  %v507_v38 = vpop.permute.xlu1 %506 }
 0x100   : > { %v423_v52 = vadd.f32 %v421_v42, %v413_v47 }
 0x101   : > { %v424_v53 = vadd.f32 %v422_v46, %v414_v48 }
 0x102   : > { %v433_v55 = vadd.f32 %v431_v49, %v423_v52 }
 0x103   : > { %v434_v56 = vadd.f32 %v432_v50, %v424_v53 }
 0x104   : > { %v439_v58 = vadd.f32 %v437_v54, %v433_v55  ;;  %v516_v47 = vpop.permute.xlu2 %515 }
 0x105   : > { %v440_v59 = vadd.f32 %v437_v54, %v434_v56 }
 0x106   : > { %v1398_v5 = vadd.f32 %v439_v58, %v1364_v43 }
 0x107   : > { %v1401_v60 = vadd.f32 %v440_v59, %v1366_v44  ;;  %v534_v54 = vpop.permute.xlu1 %533 }
 0x108   : > { %v443_v2 = vrot.slane %v1398_v5, 4 }
 0x109   : > { %v449_v61 = vrot.slane %v1401_v60, 4 }
 0x10a   : > { %v444_v62 = vadd.f32 %v443_v2, %v1398_v5 }
 0x10b   : > { %v450_v43 = vadd.f32 %v449_v61, %v1401_v60 }
 0x10c   : > { %v445_v63 = vrot.slane %v444_v62, 2 }
 0x10d   : > { %v451_v7 = vrot.slane %v450_v43, 2 }
 0x10e   : > { %v446_v44 = vadd.f32 %v445_v63, %v444_v62  ;;  %v544_v62 = vpop.permute.xlu2 %543 }
 0x10f   : > { %v452_v10 = vadd.f32 %v451_v7, %v450_v43  ;;  %v524_v7 = vpop.permute.xlu0 %523 }
 0x110   : > { %v447_v9 = vrot.slane %v446_v44, 1 }
 0x111   : > { %v453_v11 = vrot.slane %v452_v10, 1 }
 0x112   : > { %v448_v12 = vadd.f32 %v447_v9, %v446_v44 }
 0x113   : > { %v454_v8 = vadd.f32 %v453_v11, %v452_v10 }
 0x114   : > { %v455_v13 = vmul.f32 %v448_v12, %v1372_v57 }
 0x115   : > { %v456_v14 = vmul.f32 %v454_v8, %v1372_v57 }
 0x116   : > { %v457_v51 = vsub.f32 %v1398_v5, %v455_v13  ;;  %v554_v13 = vpop.permute.xlu1 %553 }
 0x117   : > { %v458_v15 = vsub.f32 %v1401_v60, %v456_v14 }
 0x118   : > { %v459_v16 = vmul.f32 %v457_v51, %v457_v51 }
 0x119   : > { %v460_v17 = vmul.f32 %v458_v15, %v458_v15 }
 0x11a   : > { %v461_v19 = vrot.slane %v459_v16, 4 }
 0x11b   : > { %v467_v3 = vrot.slane %v460_v17, 4 }
 0x11c   : > { %v462_v20 = vadd.f32 %v461_v19, %v459_v16 }
 0x11d   : > { %v468_v0 = vadd.f32 %v467_v3, %v460_v17 }
 0x11e   : > { %v463_v21 = vrot.slane %v462_v20, 2 }
 0x11f   : > { %v469_v22 = vrot.slane %v468_v0, 2 }
 0x120   : > { %v464_v23 = vadd.f32 %v463_v21, %v462_v20 }
 0x121   : > { %v470_v24 = vadd.f32 %v469_v22, %v468_v0 }
 0x122   : > { %v465_v6 = vrot.slane %v464_v23, 1 }
 0x123   : > { %v471_v25 = vrot.slane %v470_v24, 1 }
 0x124   : > { %v466_v26 = vadd.f32 %v465_v6, %v464_v23 }
 0x125   : > { %v472_v27 = vadd.f32 %v471_v25, %v470_v24 }
 0x126   : > { %v473_v28 = vmul.f32 %v466_v26, %v1372_v57  ;;  %v564_v26 = vpop.permute.xlu2 %563 }
 0x127   : > { %v474_v29 = vmul.f32 %v472_v27, %v1372_v57 }
 0x128   : > { %v475_v4 = vadd.f32 1e-05, %v473_v28 }
 0x129   : > { %v476_v30 = vadd.f32 1e-05, %v474_v29 }
 0x12a   : > { %1010 = vrsqrt.f32 %v475_v4  ;;  %vm483_vm9 = vweird.f32 %v475_v4 }
 0x12b   : > { %1012 = vrsqrt.f32 %v476_v30  ;;  %vm493_vm11 = vweird.f32 %v476_v30 }
 0x130   : > { %v1011_v31 = vpop.eup %1010 }
 0x131   : > { %v1013_v32 = vpop.eup %1012  ;;  %v478_v34 = vmul.f32 %v1011_v31, %v475_v4  ;;  %vm484_vm7 = vweird.f32 %v1011_v31 }
 0x132   : > { %v488_v35 = vmul.f32 %v1013_v32, %v476_v30  ;;  %vm494_vm8 = vweird.f32 %v1013_v32  ;;  %vm485_vm10 = vmor %vm483_vm9, %vm484_vm7 }
 0x133   : > { %v479_v36 = vmul.f32 %v1011_v31, %v478_v34  ;;  %vm495_vm12 = vmor %vm493_vm11, %vm494_vm8 }
 0x134   : > { %v489_v1 = vmul.f32 %v1013_v32, %v488_v35 }
 0x135   : > { %v480_v37 = vmul.f32 0.5, %v479_v36 }
 0x136   : > { %v490_v39 = vmul.f32 0.5, %v489_v1  ;;  %v584_v1 = vpop.permute.xlu1 %583 }
 0x137   : > { %v481_v40 = vsub.f32 1.5, %v480_v37 }
 0x138   : > { %v491_v41 = vsub.f32 1.5, %v490_v39 }
 0x139   : > { %v482_v42 = vmul.f32 %v1011_v31, %v481_v40 }
 0x13a   : > { %v492_v45 = vmul.f32 %v1013_v32, %v491_v41 }
 0x13b   : > { %v486_v46 = vsel %vm485_vm10, %v1011_v31, %v482_v42 }
 0x13c   : > { %v496_v48 = vsel %vm495_vm12, %v1013_v32, %v492_v45  ;;  %v497_v49 = vmul.f32 %v486_v46, %v457_v51  ;;  %v574_v32 = vpop.permute.xlu0 %573 }
 0x13d   : > { %v498_v50 = vmul.f32 %v496_v48, %v458_v15 }
 0x13e   : > { %v503_v52 = vmul.f32 %v501_v33, %v497_v49 }
 0x13f   : > { %v504_v53 = vmul.f32 %v501_v33, %v498_v50 }
 0x140   : > { %v509_v55 = vadd.f32 %v507_v38, %v503_v52 }
 0x141   : > { %v510_v56 = vadd.f32 %v507_v38, %v504_v53 }
 0x142   : > { %v511_v58 = vmax.f32 %v509_v55, 0.0 }
 0x143   : > { %v512_v59 = vmax.f32 %v510_v56, 0.0 }
 0x144   : > { %v518_v2 = vperm.slane %v511_v58, 0  ;;  %v536_v43 = vperm.slane %v511_v58, 2  ;;  %v526_v9 = vperm.slane %v511_v58, 1  ;;  %v546_v12 = vperm.slane %v511_v58, 3 }
 0x145   : > { %v519_v61 = vperm.slane %v512_v59, 0  ;;  %v537_v63 = vperm.slane %v512_v59, 2  ;;  %v527_v11 = vperm.slane %v512_v59, 1  ;;  %v547_v8 = vperm.slane %v512_v59, 3 }
 0x146   : > { %v520_v44 = vmul.f32 %v518_v2, %v516_v47  ;;  %v528_v14 = vmul.f32 %v526_v9, %v524_v7  ;;  %v556_v15 = vperm.slane %v511_v58, 4  ;;  %v557_v16 = vperm.slane %v512_v59, 4 }
 0x147   : > { %v521_v10 = vmul.f32 %v519_v61, %v516_v47  ;;  %v529_v51 = vmul.f32 %v527_v11, %v524_v7  ;;  %v538_v17 = vmul.f32 %v536_v43, %v534_v54  ;;  %v539_v18 = vmul.f32 %v537_v63, %v534_v54  ;;  %v594_v47 = vpop.permute.xlu2 %593 }
 0x148   : > { %v530_v19 = vadd.f32 %v528_v14, %v520_v44  ;;  %v548_v20 = vmul.f32 %v546_v12, %v544_v62  ;;  %v549_v0 = vmul.f32 %v547_v8, %v544_v62  ;;  %v566_v23 = vperm.slane %v511_v58, 5 }
 0x149   : > { %v531_v3 = vadd.f32 %v529_v51, %v521_v10  ;;  %v567_v24 = vperm.slane %v512_v59, 5  ;;  %v558_v6 = vmul.f32 %v556_v15, %v554_v13  ;;  %v559_v25 = vmul.f32 %v557_v16, %v554_v13 }
 0x14a   : > { %v540_v21 = vadd.f32 %v538_v17, %v530_v19  ;;  %v576_v29 = vperm.slane %v511_v58, 6  ;;  %v577_v4 = vperm.slane %v512_v59, 6  ;;  %v586_v30 = vperm.slane %v511_v58, 7 }
 0x14b   : > { %v541_v22 = vadd.f32 %v539_v18, %v531_v3  ;;  %v587_v31 = vperm.slane %v512_v59, 7  ;;  %v568_v35 = vmul.f32 %v566_v23, %v564_v26  ;;  %v569_v36 = vmul.f32 %v567_v24, %v564_v26 }
 0x14c   : > { %v550_v27 = vadd.f32 %v548_v20, %v540_v21  ;;  %v578_v39 = vmul.f32 %v576_v29, %v574_v32  ;;  %v579_v40 = vmul.f32 %v577_v4, %v574_v32  ;;  %v588_v41 = vmul.f32 %v586_v30, %v584_v1 }
 0x14d   : > { %v551_v28 = vadd.f32 %v549_v0, %v541_v22  ;;  %v589_v42 = vmul.f32 %v587_v31, %v584_v1 }
 0x14e   : > { %v560_v33 = vadd.f32 %v558_v6, %v550_v27  ;;  %v658_v27 = vpop.permute.xlu1 %657 }
 0x14f   : > { %v561_v34 = vadd.f32 %v559_v25, %v551_v28  ;;  %v664_v31 = vpop.permute.xlu2 %663 }
 0x150   : > { %v570_v37 = vadd.f32 %v568_v35, %v560_v33 }
 0x151   : > { %v571_v38 = vadd.f32 %v569_v36, %v561_v34 }
 0x152   : > { %v580_v45 = vadd.f32 %v578_v39, %v570_v37 }
 0x153   : > { %v581_v46 = vadd.f32 %v579_v40, %v571_v38 }
 0x154   : > { %v590_v48 = vadd.f32 %v588_v41, %v580_v45 }
 0x155   : > { %v591_v49 = vadd.f32 %v589_v42, %v581_v46 }
 0x156   : > { %v596_v50 = vadd.f32 %v594_v47, %v590_v48  ;;  %v681_v37 = vpop.permute.xlu1 %680 }
 0x157   : > { %v597_v52 = vadd.f32 %v594_v47, %v591_v49  ;;  %v691_v45 = vpop.permute.xlu2 %690 }
 0x158   : > { %v598_v53 = vadd.f32 %v596_v50, %v1398_v5 }
 0x159   : > { %v599_v54 = vadd.f32 %v597_v52, %v1401_v60 }
 0x15a   : > { %v600_v55 = vrot.slane %v598_v53, 4 }
 0x15b   : > { %v606_v56 = vrot.slane %v599_v54, 4 }
 0x15c   : > { %v601_v58 = vadd.f32 %v600_v55, %v598_v53 }
 0x15d   : > { %v607_v59 = vadd.f32 %v606_v56, %v599_v54 }
 0x15e   : > { %v602_v2 = vrot.slane %v601_v58, 2 }
 0x15f   : > { %v608_v61 = vrot.slane %v607_v59, 2 }
 0x160   : > { %v603_v62 = vadd.f32 %v602_v2, %v601_v58 }
 0x161   : > { %v609_v43 = vadd.f32 %v608_v61, %v607_v59 }
 0x162   : > { %v604_v63 = vrot.slane %v603_v62, 1 }
 0x163   : > { %v610_v7 = vrot.slane %v609_v43, 1 }
 0x164   : > { %v605_v44 = vadd.f32 %v604_v63, %v603_v62  ;;  %v711_v62 = vpop.permute.xlu2 %710 }
 0x165   : > { %v611_v10 = vadd.f32 %v610_v7, %v609_v43 }
 0x166   : > { %v612_v9 = vmul.f32 %v605_v44, %v1372_v57 }
 0x167   : > { %v613_v11 = vmul.f32 %v611_v10, %v1372_v57 }
 0x168   : > { %v614_v12 = vsub.f32 %v598_v53, %v612_v9  ;;  %v701_v53 = vpop.permute.xlu1 %700 }
 0x169   : > { %v615_v5 = vsub.f32 %v599_v54, %v613_v11  ;;  %v673_v54 = vpop.permute.xlu0 %672 }
 0x16a   : > { %v616_v8 = vmul.f32 %v614_v12, %v614_v12 }
 0x16b   : > { %v617_v60 = vmul.f32 %v615_v5, %v615_v5 }
 0x16c   : > { %v618_v13 = vrot.slane %v616_v8, 4 }
 0x16d   : > { %v624_v14 = vrot.slane %v617_v60, 4 }
 0x16e   : > { %v619_v51 = vadd.f32 %v618_v13, %v616_v8 }
 0x16f   : > { %v625_v15 = vadd.f32 %v624_v14, %v617_v60 }
 0x170   : > { %v620_v16 = vrot.slane %v619_v51, 2 }
 0x171   : > { %v626_v17 = vrot.slane %v625_v15, 2 }
 0x172   : > { %v621_v18 = vadd.f32 %v620_v16, %v619_v51 }
 0x173   : > { %v627_v19 = vadd.f32 %v626_v17, %v625_v15 }
 0x174   : > { %v622_v3 = vrot.slane %v621_v18, 1 }
 0x175   : > { %v628_v20 = vrot.slane %v627_v19, 1 }
 0x176   : > { %v623_v0 = vadd.f32 %v622_v3, %v621_v18  ;;  %v721_v3 = vpop.permute.xlu0 %720 }
 0x177   : > { %v629_v21 = vadd.f32 %v628_v20, %v627_v19  ;;  %v731_v19 = vpop.permute.xlu1 %730 }
 0x178   : > { %v630_v22 = vmul.f32 %v623_v0, %v1372_v57 }
 0x179   : > { %v631_v23 = vmul.f32 %v629_v21, %v1372_v57 }
 0x17a   : > { %v632_v24 = vadd.f32 1e-05, %v630_v22 }
 0x17b   : > { %v633_v6 = vadd.f32 1e-05, %v631_v23 }
 0x17c   : > { %1014 = vrsqrt.f32 %v632_v24  ;;  %vm640_vm15 = vweird.f32 %v632_v24 }
 0x17d   : > { %1016 = vrsqrt.f32 %v633_v6  ;;  %vm650_vm1 = vweird.f32 %v633_v6 }
 0x182   : > { %v1015_v25 = vpop.eup %1014 }
 0x183   : > { %v1017_v26 = vpop.eup %1016  ;;  %v635_v28 = vmul.f32 %v1015_v25, %v632_v24  ;;  %vm641_vm13 = vweird.f32 %v1015_v25 }
 0x184   : > { %v645_v29 = vmul.f32 %v1017_v26, %v633_v6  ;;  %vm651_vm14 = vweird.f32 %v1017_v26  ;;  %vm642_vm0 = vmor %vm640_vm15, %vm641_vm13 }
 0x185   : > { %v636_v4 = vmul.f32 %v1015_v25, %v635_v28  ;;  %vm652_vm2 = vmor %vm650_vm1, %vm651_vm14  ;;  %v741_v28 = vpop.permute.xlu2 %740 }
 0x186   : > { %v646_v30 = vmul.f32 %v1017_v26, %v645_v29 }
 0x187   : > { %v637_v32 = vmul.f32 0.5, %v636_v4 }
 0x188   : > { %v647_v33 = vmul.f32 0.5, %v646_v30 }
 0x189   : > { %v638_v34 = vsub.f32 1.5, %v637_v32 }
 0x18a   : > { %v648_v35 = vsub.f32 1.5, %v647_v33 }
 0x18b   : > { %v639_v36 = vmul.f32 %v1015_v25, %v638_v34 }
 0x18c   : > { %v649_v57 = vmul.f32 %v1017_v26, %v648_v35 }
 0x18d   : > { %v643_v1 = vsel %vm642_vm0, %v1015_v25, %v639_v36  ;;  %v752_v36 = vpop.permute.xlu1 %751 }
 0x18e   : > { %v653_v38 = vsel %vm652_vm2, %v1017_v26, %v649_v57  ;;  %v654_v39 = vmul.f32 %v643_v1, %v614_v12 }
 0x18f   : > { %v655_v40 = vmul.f32 %v653_v38, %v615_v5 }
 0x190   : > { %v660_v41 = vmul.f32 %v658_v27, %v654_v39 }
 0x191   : > { %v661_v42 = vmul.f32 %v658_v27, %v655_v40 }
 0x192   : > { %v666_v46 = vadd.f32 %v664_v31, %v660_v41 }
 0x193   : > { %v667_v47 = vadd.f32 %v664_v31, %v661_v42 }
 0x194   : > { %v668_v48 = vmax.f32 %v666_v46, 0.0 }
 0x195   : > { %v669_v49 = vmax.f32 %v667_v47, 0.0 }
 0x196   : > { %v683_v50 = vperm.slane %v668_v48, 1  ;;  %v693_v55 = vperm.slane %v668_v48, 2  ;;  %v675_v2 = vperm.slane %v668_v48, 0  ;;  %v703_v43 = vperm.slane %v668_v48, 3 }
 0x197   : > { %v684_v52 = vperm.slane %v669_v49, 1  ;;  %v694_v56 = vperm.slane %v669_v49, 2  ;;  %v676_v61 = vperm.slane %v669_v49, 0  ;;  %v704_v63 = vperm.slane %v669_v49, 3 }
 0x198   : > { %v685_v58 = vmul.f32 %v683_v50, %v681_v37  ;;  %v677_v7 = vmul.f32 %v675_v2, %v673_v54  ;;  %v713_v10 = vperm.slane %v668_v48, 4  ;;  %v714_v9 = vperm.slane %v669_v49, 4 }
 0x199   : > { %v686_v59 = vmul.f32 %v684_v52, %v681_v37  ;;  %v678_v44 = vmul.f32 %v676_v61, %v673_v54  ;;  %v695_v11 = vmul.f32 %v693_v55, %v691_v45  ;;  %v696_v12 = vmul.f32 %v694_v56, %v691_v45 }
 0x19a   : > { %v687_v5 = vadd.f32 %v685_v58, %v677_v7  ;;  %v705_v60 = vmul.f32 %v703_v43, %v701_v53  ;;  %v706_v13 = vmul.f32 %v704_v63, %v701_v53  ;;  %v723_v15 = vperm.slane %v668_v48, 5 }
 0x19b   : > { %v688_v8 = vadd.f32 %v686_v59, %v678_v44  ;;  %v724_v16 = vperm.slane %v669_v49, 5  ;;  %v715_v17 = vmul.f32 %v713_v10, %v711_v62  ;;  %v716_v18 = vmul.f32 %v714_v9, %v711_v62 }
 0x19c   : > { %v697_v14 = vadd.f32 %v695_v11, %v687_v5  ;;  %v733_v20 = vperm.slane %v668_v48, 6  ;;  %v734_v0 = vperm.slane %v669_v49, 6  ;;  %v743_v23 = vperm.slane %v668_v48, 7 }
 0x19d   : > { %v698_v51 = vadd.f32 %v696_v12, %v688_v8  ;;  %v744_v24 = vperm.slane %v669_v49, 7  ;;  %v725_v26 = vmul.f32 %v723_v15, %v721_v3  ;;  %v726_v27 = vmul.f32 %v724_v16, %v721_v3 }
 0x19e   : > { %v707_v21 = vadd.f32 %v705_v60, %v697_v14  ;;  %v735_v29 = vmul.f32 %v733_v20, %v731_v19  ;;  %v736_v4 = vmul.f32 %v734_v0, %v731_v19  ;;  %v745_v32 = vmul.f32 %v743_v23, %v741_v28 }
 0x19f   : > { %v708_v22 = vadd.f32 %v706_v13, %v698_v51  ;;  %v746_v33 = vmul.f32 %v744_v24, %v741_v28 }
 0x1a0   : > { %v717_v6 = vadd.f32 %v715_v17, %v707_v21 }
 0x1a1   : > { %v718_v25 = vadd.f32 %v716_v18, %v708_v22 }
 0x1a2   : > { %v727_v30 = vadd.f32 %v725_v26, %v717_v6 }
 0x1a3   : > { %v728_v31 = vadd.f32 %v726_v27, %v718_v25 }
 0x1a4   : > { %v737_v34 = vadd.f32 %v735_v29, %v727_v30 }
 0x1a5   : > { %v738_v35 = vadd.f32 %v736_v4, %v728_v31 }
 0x1a6   : > { %v747_v57 = vadd.f32 %v745_v32, %v737_v34 }
 0x1a7   : > { %v748_v1 = vadd.f32 %v746_v33, %v738_v35 }
 0x1a8   : > { %v754_v37 = vadd.f32 %v752_v36, %v747_v57 }
 0x1a9   : > { %v755_v38 = vadd.f32 %v752_v36, %v748_v1 }
 0x1aa   : > { %756 = vst [vmem:[%s219_s28] sm:$0xff] %v754_v37 }
 0x1ab   : > { %757 = vst [vmem:[%s219_s28 + $0x8] sm:$0xff] %v755_v38 }
 0x1ac   : > { %1135 = shalt.err (!%p1132_p11)
}
 0x1ad   : > { %894 = dma.vmem_to_hbm [thread:$0]  (%p1286_p5), %s773_s16, 256, %s775_s29, %s759_s30  }
 0x1ae PF: > { %s786_s11 = sand.u32 1, %s1166_s12   ;;  %p1467_p12 = scmp.ge.s32.totalorder %s1178_s15, 2 }
 0x1af   : > { %s787_s22 = scalar_lea.sflag [#allocation4], %s786_s11 }
 0x1b0   : > { %p908_p13 = pnand %p1467_p12, %p1252_p6 }
 0x1b2   : > { %p909_p0 = pneg %p908_p13 }
 0x1b4   : > { %1161 = dma.done.wait (%p909_p0), %s787_s22, 256  }
 0x1b5   : > { %1163 = vsyncadd (%p909_p0), %s787_s22, 4294967040  ;;  %p17_p3 = scmp.ge.s32.totalorder %s1273_s6, 4   ;;  %s1468_s12 = smov %s1170_s13 }
 0x1b6   : > { %s1469_s13 = smov %s1174_s14  ;;  %s1470_s14 = smov %s1282_s9 }
 0x1b7   : > { %s1471_s15 = smov %s1273_s6  ;;  %19 = sbr.rel (!%p17_p3) target bundleno = 6 (0x6), region = 88 }
 0x1bc   :  { %793 = vsyncpa [#allocation3], 1 }
 0x1bd   :  { %795 = vsyncpa [#allocation3 + $0x1], 1 }
 0x1be   :  { %796 = vsyncpa [#allocation6], 1 }
 0x1bf   :  { %797 = vsyncpa [#allocation4], 1 }
 0x1c0   :  { %799 = vsyncpa [#allocation4 + $0x1], 1 }

</bundles_post_ra>
